<compile_context>
chip_gen: v6e
topology: v6e:2x2x1
jax: 0.10.0
libtpu: 0.0.40
codegen_flags: <defaults>
</compile_context>

<pallas_src>
import functools

import numpy as np
import jax
import jax.numpy as jnp
from jax import lax
from jax.experimental import pallas as pl
from jax.experimental.pallas import tpu as pltpu


# bias_act default gains: sqrt(2) for (l)relu, 1 otherwise.
_ACT_GAINS = {
    "linear": 1.0,
    "relu": float(np.sqrt(2.0)),
    "lrelu": float(np.sqrt(2.0)),
    "tanh": 1.0,
    "sigmoid": 1.0,
}
# TODO(synk): remaining bias_act activations (elu/selu/softplus/swish/clamp) are not
# wired up; unknown activation strings raise instead of silently acting as linear.


def _apply_activation(y, activation, act_gain):
    if activation == "linear":
        out = y
    elif activation == "relu":
        out = jnp.maximum(y, 0.0)
    elif activation == "lrelu":
        out = jnp.where(y >= 0.0, y, 0.2 * y)
    elif activation == "tanh":
        out = jnp.tanh(y)
    elif activation == "sigmoid":
        out = jax.nn.sigmoid(y)
    else:
        raise ValueError(f"unsupported activation: {activation!r}")
    if act_gain != 1.0:
        out = out * act_gain
    return out


def _round_up(a, b):
    return -(-a // b) * b


def _cdiv(a, b):
    return -(-a // b)


def _vmem_capacity_bytes():
    try:
        return int(pltpu.get_tpu_info().vmem_capacity_bytes)
    except Exception:
        return 64 << 20  # v7x per-TensorCore: most conservative assumption


# ------------------------------ kernels -------------------------------------


def _fc_kernel_single_k(x_ref, w_ref, b_ref, o_ref, *,
                        weight_gain, bias_gain, activation, act_gain):
    """K fits in one block: no k grid axis, no accumulator scratch.

    w_ref block is [tn, K]; contract last dims of both (NT form) => x @ w.T
    directly on the MXU.
    """
    acc = lax.dot_general(
        x_ref[...], w_ref[...],
        dimension_numbers=(((1,), (1,)), ((), ())),
        preferred_element_type=jnp.float32)
    out = acc * weight_gain + b_ref[...] * bias_gain
    o_ref[...] = _apply_activation(out, activation, act_gain).astype(o_ref.dtype)


def _fc_kernel_multi_k(x_ref, w_ref, b_ref, o_ref, acc_ref, *,
                       weight_gain, bias_gain, activation, act_gain, k_rem):
    """Tiled reduction over K (innermost grid axis) with an f32 VMEM accumulator.

    If K % tk != 0 (static `k_rem`), the last k block's tail columns of both
    operands are masked to zero so stale-VMEM garbage never enters the sum.
    """
    k = pl.program_id(2)
    x = x_ref[...]
    w = w_ref[...]
    if k_rem:  # static python check — no cost when K divides tk
        last = pl.num_programs(2) - 1
        keep = k != last
        xcol = lax.broadcasted_iota(jnp.int32, x.shape, 1)
        wcol = lax.broadcasted_iota(jnp.int32, w.shape, 1)
        x = jnp.where(keep | (xcol < k_rem), x, jnp.zeros_like(x))
        w = jnp.where(keep | (wcol < k_rem), w, jnp.zeros_like(w))

    part = lax.dot_general(
        x, w,
        dimension_numbers=(((1,), (1,)), ((), ())),
        preferred_element_type=jnp.float32)

    @pl.when(k == 0)
    def _():
        acc_ref[...] = part          # assign, not zero-init + add

    @pl.when(k > 0)
    def _():
        acc_ref[...] += part

    @pl.when(k == pl.num_programs(2) - 1)
    def _():
        out = acc_ref[...] * weight_gain + b_ref[...] * bias_gain
        o_ref[...] = _apply_activation(out, activation, act_gain).astype(o_ref.dtype)


# ------------------------------ references ----------------------------------


def fully_connected_ref(x, weight, bias=None, *, lr_multiplier=1.0,
                        activation="linear"):
    """Pure-JAX reference mirroring the PyTorch forward (f32 math)."""
    K = x.shape[1]
    w = weight.astype(x.dtype) * (lr_multiplier / np.sqrt(K))
    y = jnp.matmul(x, w.T, precision=lax.Precision.HIGHEST)
    if bias is not None:
        b = bias.astype(x.dtype)
        if lr_multiplier != 1:
            b = b * lr_multiplier
        y = y + b
    return _apply_activation(
        y.astype(jnp.float32), activation, _ACT_GAINS[activation]).astype(x.dtype)


def _matched_ref(x, weight, bias, *, lr_multiplier, activation, compute_dtype):
    """Same math as the kernel: operands rounded to compute_dtype, f32 accumulate."""
    K = x.shape[1]
    xr = x.astype(compute_dtype).astype(jnp.float32)
    wr = weight.astype(compute_dtype).astype(jnp.float32)
    y = jnp.matmul(xr, wr.T, precision=lax.Precision.HIGHEST)
    y = y * (lr_multiplier / np.sqrt(K))
    if bias is not None:
        y = y + bias.astype(jnp.float32) * lr_multiplier
    return _apply_activation(y, activation, _ACT_GAINS[activation]).astype(x.dtype)


# ------------------------------ wrapper --------------------------------------


def fully_connected_layer(x, weight, bias=None, *,
                          lr_multiplier=1.0, activation="linear",
                          compute_dtype=None,
                          tm=None, tn=None, tk=None, use_pallas=None):
    """x: [M, K]; weight: [N, K] (PyTorch layout, NOT transposed); bias: [N] or None."""
    M, K = x.shape
    N, K2 = weight.shape
    assert K == K2, (K, K2)
    if activation not in _ACT_GAINS:
        raise ValueError(f"unsupported activation: {activation!r}")
    out_dtype = x.dtype

    # Tiny problems: per-grid-step + DMA setup overhead dominates; let XLA do it.
    if use_pallas is None:
        use_pallas = (M * N * K) >= (1 << 22)
    if not use_pallas:
        return fully_connected_ref(x, weight, bias,
                                   lr_multiplier=lr_multiplier,
                                   activation=activation)

    # MXU operand dtype: bf16 by default (all generations are bf16-native);
    # accumulation stays f32 via preferred_element_type.
    if compute_dtype is None:
        compute_dtype = jnp.bfloat16 if x.dtype == jnp.float32 else x.dtype
    compute_dtype = jnp.dtype(compute_dtype)
    ibc = compute_dtype.itemsize
    ob = jnp.dtype(out_dtype).itemsize

    weight_gain = float(lr_multiplier) / float(np.sqrt(K))
    bias_gain = float(lr_multiplier)
    act_gain = _ACT_GAINS[activation]

    vmem_cap = _vmem_capacity_bytes()

    # ---- K split ------------------------------------------------------------
    if tk is None:
        tk = K if K <= 2048 else 1024
    nk = _cdiv(K, tk)
    multi_k = nk > 1
    if multi_k and (tk % 128 != 0):
        raise ValueError("tk must be a multiple of 128 when K is tiled")
    k_rem = (K % tk) if multi_k else 0
    kdim = tk if multi_k else K

    # ---- tm -----------------------------------------------------------------
    sub_align = 16 if ibc < 4 else 8
    tm_auto = tm is None
    tm_target = 1024 if (M >= 2048 and M >= 2 * N) else 512
    if tm_auto:
        tm = M if M <= tm_target else (tm_target // sub_align) * sub_align

    # ---- tn (weight-resident fast path when the whole [N,K] weight fits) -----
    tn_target = 1024 if (N >= 2048 and N >= 2 * M) else 512
    if tn is None:
        resident_budget = min(8 << 20, vmem_cap // 8)
        if (not multi_k) and N * K * ibc <= resident_budget \
                and tm * N * ob <= (8 << 20):
            tn = N                      # weight DMA'd once, stays resident in VMEM
        elif N <= tn_target:
            tn = N
        else:
            tn = (tn_target // 128) * 128   # lane-aligned interior tiles

    gm = _cdiv(M, tm)
    gn = _cdiv(N, tn)
    # v7x: make sure there are >=2 parallel blocks so both TensorCores get work.
    if tm_auto and gm * gn == 1 and M >= 2 * sub_align:
        tm = _round_up(_cdiv(M, 2), sub_align)
        gm = _cdiv(M, tm)

    # ---- operand prep (no M/N padding, no output slice) ----------------------
    x_c = x.astype(compute_dtype)
    w_c = weight.astype(compute_dtype)
    if bias is None:
        b2d = jnp.zeros((1, N), jnp.float32)
    else:
        b2d = bias.astype(jnp.float32).reshape(1, N)

    # ---- VMEM budget + cost hint ---------------------------------------------
    vmem_bytes = (2 * tm * kdim * ibc          # x tiles (double-buffered)
                  + 2 * tn * kdim * ibc        # weight tiles
                  + 2 * tm * tn * ob           # output tiles
                  + 2 * tn * 4                 # bias tile
                  + (tm * tn * 4 if multi_k else 0))   # f32 accumulator
    vmem_limit = int(min(max(vmem_bytes + (8 << 20), 32 << 20),
                         vmem_cap * 7 // 8))

    cost = pl.CostEstimate(
        flops=2 * M * N * K,
        transcendentals=(M * N if activation in ("tanh", "sigmoid") else 0),
        bytes_accessed=(M * K + N * K) * ibc + N * 4 + M * N * ob)

    if not multi_k:
        kernel = functools.partial(
            _fc_kernel_single_k, weight_gain=weight_gain, bias_gain=bias_gain,
            activation=activation, act_gain=act_gain)
        out = pl.pallas_call(
            kernel,
            out_shape=jax.ShapeDtypeStruct((M, N), out_dtype),
            grid_spec=pltpu.PrefetchScalarGridSpec(
                num_scalar_prefetch=0,
                grid=(gm, gn),
                in_specs=[
                    pl.BlockSpec((tm, K), lambda i, j: (i, 0)),   # x tile
                    pl.BlockSpec((tn, K), lambda i, j: (j, 0)),   # weight [N,K] tile
                    pl.BlockSpec((1, tn), lambda i, j: (0, j)),   # bias tile
                ],
                out_specs=pl.BlockSpec((tm, tn), lambda i, j: (i, j)),
            ),
            compiler_params=pltpu.CompilerParams(
                dimension_semantics=("parallel", "parallel"),
                vmem_limit_bytes=vmem_limit),
            cost_estimate=cost,
        )(x_c, w_c, b2d)
    else:
        kernel = functools.partial(
            _fc_kernel_multi_k, weight_gain=weight_gain, bias_gain=bias_gain,
            activation=activation, act_gain=act_gain, k_rem=k_rem)
        out = pl.pallas_call(
            kernel,
            out_shape=jax.ShapeDtypeStruct((M, N), out_dtype),
            grid_spec=pltpu.PrefetchScalarGridSpec(
                num_scalar_prefetch=0,
                grid=(gm, gn, nk),
                in_specs=[
                    pl.BlockSpec((tm, tk), lambda i, j, k: (i, k)),   # x tile
                    pl.BlockSpec((tn, tk), lambda i, j, k: (j, k)),   # weight tile
                    pl.BlockSpec((1, tn), lambda i, j, k: (0, j)),    # bias tile
                ],
                out_specs=pl.BlockSpec((tm, tn), lambda i, j, k: (i, j)),
                scratch_shapes=[pltpu.VMEM((tm, tn), jnp.float32)],
            ),
            compiler_params=pltpu.CompilerParams(
                dimension_semantics=("parallel", "parallel", "arbitrary"),
                vmem_limit_bytes=vmem_limit),
            cost_estimate=cost,
        )(x_c, w_c, b2d)

    return out


# ------------------------------ self-test ------------------------------------

if __name__ == "__main__":
    key = jax.random.PRNGKey(0)
    k1, k2, k3, k4, k5, k6, k7, k8 = jax.random.split(key, 8)
    cdt = jnp.bfloat16      # default compute dtype for f32 inputs
    ok = True

    def check(y, x, weight, bias, lr, act):
        y = np.asarray(jax.block_until_ready(y), dtype=np.float32)
        y_match = np.asarray(_matched_ref(x, weight, bias, lr_multiplier=lr,
                                          activation=act, compute_dtype=cdt),
                             dtype=np.float32)
        y_spec = np.asarray(fully_connected_ref(x, weight, bias, lr_multiplier=lr,
                                                activation=act), dtype=np.float32)
        tight = np.allclose(y, y_match, rtol=1e-3, atol=1e-3)     # kernel math exact
        loose = np.allclose(y, y_spec, rtol=2e-2, atol=5e-2)      # module semantics
        return tight and loose

    # --- Test 1: module-sized example (in=32, out=64, batch=16), resident weight ---
    in_f, out_f, batch = 32, 64, 16
    lr_mult, bias_init = 0.5, 0.1
    weight1 = jax.random.normal(k1, (out_f, in_f), dtype=jnp.float32) / lr_mult
    bias1 = jnp.full((out_f,), np.float32(bias_init), dtype=jnp.float32)
    x1 = jax.random.normal(k2, (batch, in_f), dtype=jnp.float32)
    for act in ("linear", "lrelu"):
        y = fully_connected_layer(x1, weight1, bias1, lr_multiplier=lr_mult,
                                  activation=act, use_pallas=True)
        ok &= check(y, x1, weight1, bias1, lr_mult, act)

    # --- Test 2: single-K path with tiled N (forced tn), lrelu ---
    M2, K2d, N2 = 64, 128, 384
    weight2 = jax.random.normal(k3, (N2, K2d), dtype=jnp.float32)
    bias2 = jnp.full((N2,), np.float32(0.05), dtype=jnp.float32)
    x2 = jax.random.normal(k4, (M2, K2d), dtype=jnp.float32)
    y = fully_connected_layer(x2, weight2, bias2, lr_multiplier=1.0,
                              activation="lrelu", tn=128, use_pallas=True)
    ok &= check(y, x2, weight2, bias2, 1.0, "lrelu")

    # --- Test 3: multi-K tiled reduction path (forced tk), linear ---
    M3, K3d, N3 = 64, 256, 256
    weight3 = jax.random.normal(k5, (N3, K3d), dtype=jnp.float32)
    bias3 = jnp.full((N3,), np.float32(0.02), dtype=jnp.float32)
    x3 = jax.random.normal(k6, (M3, K3d), dtype=jnp.float32)
    y = fully_connected_layer(x3, weight3, bias3, lr_multiplier=1.0,
                              activation="linear", tk=128, use_pallas=True)
    ok &= check(y, x3, weight3, bias3, 1.0, "linear")

    # --- Test 4: ragged M/N/K (edge blocks + K-tail mask), no bias, lrelu ---
    M4, K4d, N4 = 50, 200, 192
    weight4 = jax.random.normal(k7, (N4, K4d), dtype=jnp.float32)
    x4 = jax.random.normal(k8, (M4, K4d), dtype=jnp.float32)
    y = fully_connected_layer(x4, weight4, None, lr_multiplier=1.0,
                              activation="lrelu", tk=128, use_pallas=True)
    ok &= check(y, x4, weight4, None, 1.0, "lrelu")

    if ok:
        print("KERNEL_OK")
    else:
        print("KERNEL_MISMATCH")
</pallas_src>

<mosaic_0001>
module attributes {stable_mosaic.version = 11 : i64} {
  func.func @_fc_kernel_single_k(%arg0: i32, %arg1: i32, %arg2: memref<16x32xbf16, #tpu.memory_space<vmem>>, %arg3: memref<64x32xbf16, #tpu.memory_space<vmem>>, %arg4: memref<1x64xf32, #tpu.memory_space<vmem>>, %arg5: memref<16x64xf32, #tpu.memory_space<vmem>>) attributes {dimension_semantics = [#tpu.dimension_semantics<parallel>, #tpu.dimension_semantics<parallel>], iteration_bounds = array<i64: 1, 1>, scalar_prefetch = 0 : i64, scratch_operands = 0 : i64, tpu.core_type = #tpu.core_type<tc>, window_params = [{transform_indices = @transform_0, window_bounds = array<i64: 16, 32>}, {transform_indices = @transform_1, window_bounds = array<i64: 64, 32>}, {transform_indices = @transform_2, window_bounds = array<i64: 1, 64>}, {transform_indices = @transform_3, window_bounds = array<i64: 16, 64>}]} {
    %c0 = arith.constant 0 : index
    %c0_0 = arith.constant 0 : index
    %0 = vector.load %arg2[%c0, %c0_0] : memref<16x32xbf16, #tpu.memory_space<vmem>>, vector<16x32xbf16>
    %c0_1 = arith.constant 0 : index
    %c0_2 = arith.constant 0 : index
    %1 = vector.load %arg3[%c0_1, %c0_2] : memref<64x32xbf16, #tpu.memory_space<vmem>>, vector<64x32xbf16>
    %cst = arith.constant dense<0.000000e+00> : vector<16x64xf32>
    %2 = tpu.matmul %0, %1, %cst {dimension_numbers = #tpu.dot_dimension_numbers<[1], [1], [0], [0], [0, 0, 1, 0], [], []>} : vector<16x32xbf16>, vector<64x32xbf16>, vector<16x64xf32> -> vector<16x64xf32>
    %cst_3 = arith.constant 0.0883883461 : f32
    %3 = vector.broadcast %cst_3 : f32 to vector<16x64xf32>
    %4 = arith.mulf %2, %3 : vector<16x64xf32>
    %c0_4 = arith.constant 0 : index
    %c0_5 = arith.constant 0 : index
    %5 = vector.load %arg4[%c0_4, %c0_5] : memref<1x64xf32, #tpu.memory_space<vmem>>, vector<1x64xf32>
    %cst_6 = arith.constant 5.000000e-01 : f32
    %6 = vector.broadcast %cst_6 : f32 to vector<1x64xf32>
    %7 = arith.mulf %5, %6 : vector<1x64xf32>
    %8 = vector.broadcast %7 : vector<1x64xf32> to vector<16x64xf32>
    %9 = arith.addf %4, %8 : vector<16x64xf32>
    %c0_7 = arith.constant 0 : index
    %c0_8 = arith.constant 0 : index
    %10 = vector.load %arg5[%c0_7, %c0_8] : memref<16x64xf32, #tpu.memory_space<vmem>>, vector<16x64xf32>
    tpu.vector_store %arg5[%c0_7, %c0_8], %9 {strides = array<i32>} : memref<16x64xf32, #tpu.memory_space<vmem>>, vector<16x64xf32>,
    return
  }
  func.func @transform_0(%arg0: i32, %arg1: i32) -> (i32, i32) {
    %c0_i32 = arith.constant 0 : i32
    %c0_i32_0 = arith.constant 0 : i32
    return %arg0, %c0_i32 : i32, i32
  }
  func.func @transform_1(%arg0: i32, %arg1: i32) -> (i32, i32) {
    %c0_i32 = arith.constant 0 : i32
    %c0_i32_0 = arith.constant 0 : i32
    return %arg1, %c0_i32 : i32, i32
  }
  func.func @transform_2(%arg0: i32, %arg1: i32) -> (i32, i32) {
    %c0_i32 = arith.constant 0 : i32
    %c0_i32_0 = arith.constant 0 : i32
    return %c0_i32, %arg1 : i32, i32
  }
  func.func @transform_3(%arg0: i32, %arg1: i32) -> (i32, i32) {
    %c0_i32 = arith.constant 0 : i32
    return %arg0, %arg1 : i32, i32
  }
}

</mosaic_0001>

<bundles_post_ra>
// kernel: tpu_custom_call.1
= control target key start
LH: loop header
LB: loop body
LE: loop exit
PB: predicated region body
PF: predicated region fallthrough
CT: control target
= control target key end

     0   :  { %v194_v1 = vmov 0.0   ;;  %vm51_vm0 = vcmask 261120   ;;  %vm195_vm1 = vmmov 0   ;;  %s245_s0 = inlined_call_operand.vmem [shape: bf16[16,32], index: 0, kind: input, shape index: {}]   ;;  %s246_s1 = inlined_call_operand.vmem [shape: bf16[64,32], index: 1, kind: input, shape index: {}]   ;;  %s247_s2 = inlined_call_operand.vmem [shape: f32[1,64], index: 2, kind: input, shape index: {}]   ;;  %s248_s3 = inlined_call_operand.hbm [shape: f32[16,64], index: 3, kind: output, shape index: {}]  }
   0x1   :  { %v167_v0 = vld [vmem:[%s246_s1 + $0x18] sm:$0xff]   ;;  %150 = vmatprep.subr.bf16.mxu0 %v194_v1  ;;  %v168_v3 = vld [vmem:[%s246_s1 + $0x10] sm:$0xff]   ;;  %158 = vmatprep.mubr.msk.bf16.mxu0 %vm195_vm1, %v194_v1 }
   0x2   :  { %v65_v2 = vsel %vm51_vm0, %v167_v0, 0 }
   0x3   :  { %151 = vmatpush3.bf16.xpose.msra.mxu0 %v65_v2 }
   0x4   :  { %152 = vmatprep.subr.bf16.mxu0 %v194_v1 }
   0x5   :  { %8 = vsyncpa [#allocation3], 0  ;;  %v62_v4 = vsel %vm51_vm0, %v168_v3, 0  ;;  %v169_v5 = vld [vmem:[%s246_s1 + $0x8] sm:$0xff]   ;;  %v170_v7 = vld [vmem:[%s246_s1] sm:$0xff]   ;;  %v113_v10 = vlaneseq  ;;  %vm120_vm2 = vcmask 523264  }
   0x6   :  { %v59_v6 = vsel %vm51_vm0, %v169_v5, 0  ;;  %v56_v8 = vsel %vm51_vm0, %v170_v7, 0  ;;  %v171_v9 = vld [vmem:[%s245_s0] sm:$0xff]   ;;  %s196_s1 = smov [#allocation2]  }
   0x7   :  { %v114_v11 = vshrl.u32 %v113_v10, 7  ;;  %v110_v12 = vld [vmem:[%s247_s2] sm:$0x1]  ;;  %s128_s24 = sshll.u32 %s196_s1, 4  ;;  %s129_s24 = int_to_ptr.vmem [resolvable:$true] %s128_s24 }
   0x8   :  { %v111_v13 = vmul.f32 0.5, %v110_v12  ;;  %s172_s0 = scalar_lea.vmem %s129_s24, 256  ;;  %p177_p1 = scmp.lt.s32.totalorder %s129_s24, %s129_s24 }
   0x9   :  { %v115_v14 = vsub.s32 0, %v114_v11  ;;  %p173_p0 = scmp.ne.s32.totalorder %s129_s24, %s172_s0  ;;  %p178_p2 = scmp.lt.s32.totalorder %s172_s0, %s172_s0 }
   0xb   :  { %153 = vmatpush3.bf16.xpose.msra.mxu0 %v62_v4  ;;  %v116_v15 = vrot.slane %v111_v13, %v115_v14  ;;  %p179_p3 = por %p178_p2, %p177_p1 }
   0xc   :  { %154 = vmatprep.subr.bf16.mxu0 %v194_v1 }
   0xd   :  { %p180_p4 = pnand %p179_p3, %p173_p0 }
  0x13   :  { %155 = vmatpush3.bf16.xpose.msra.mxu0 %v59_v6 }
  0x14   :  { %156 = vmatprep.subr.bf16.mxu0 %v194_v1 }
  0x1b   :  { %157 = vmatpush3.bf16.xpose.msra.mxu0 %v56_v8 }
  0x22   :  { %159 = vmatmul.mubr.msk.bf16.vlgmr.msra.gmra.mxu0 %vm51_vm0, %v171_v9 }
  0xe2   :  { %v101_v16 = vpop.f32.mrf.mxu0 }
  0xe3   :  { %v108_v17 = vmul.f32 0.088388346, %v101_v16 }
  0xe4   :  { %v160_v18 = vpop.f32.mrf.mxu0 }
  0xe5   :  { %v118_v19 = vadd.f32 %v116_v15, %v108_v17 }
  0xe6   :  { %v104_v20 = vpop.f32.mrf.mxu0 }
  0xe7   :  { %121 = vst.msk [vmem:[#allocation2] sm:$0xff] %vm120_vm2, %v118_v19  ;;  %v109_v21 = vmul.f32 0.088388346, %v104_v20 }
  0xe8   :  { %v161_v22 = vpop.f32.mrf.mxu0 }
  0xe9   :  { %v119_v23 = vadd.f32 %v116_v15, %v109_v21 }
  0xeb   :  { %122 = vst.msk [vmem:[#allocation2 + $0x8] sm:$0xff] %vm120_vm2, %v119_v23 }
  0xec   :  { %183 = shalt.err (!%p180_p4)
}
  0xed   :  { %s197_s2 = smov 128   ;;  %s198_s25 = smov 8  }
  0xee   :  { %134 = dma.vmem_to_hbm [thread:$0]  %s129_s24, 256, %s248_s3, [#allocation3], %s197_s2, %s197_s2, %s198_s25  }
  0xef   :  { %192 = dma.done.wait [#allocation3], 256  }
  0xf0   :  { %193 = vsyncadd [#allocation3], 4294967040 }
  0xf1   :  { %138 = vsyncpa [#allocation3], 1 }

</bundles_post_ra>
